<compile_context>
chip_gen: v7x
topology: tpu7x:2x2x1
jax: 0.10.0
libtpu: 0.0.40
codegen_flags: <defaults>
</compile_context>

<pallas_src>
import jax
import jax.numpy as jnp
from jax.experimental import pallas as pl
from jax.experimental.pallas import tpu as pltpu


def _value_mlp_kernel(x_ref, w1_ref, b1_ref, w2_ref, b2_ref, w3_ref, b3_ref,
                      o_ref):
    # One batch tile per grid step; three matmuls + ReLUs fused in-kernel.
    x = x_ref[...]                       # (TM, in_size), already f32
    b1 = b1_ref[...]                     # read biases once; broadcast over TM
    b2 = b2_ref[...]
    b3 = b3_ref[...]

    h1 = jnp.dot(x, w1_ref[...], preferred_element_type=jnp.float32) + b1
    h1 = jnp.maximum(h1, 0.0)

    h2 = jnp.dot(h1, w2_ref[...], preferred_element_type=jnp.float32) + b2
    h2 = jnp.maximum(h2, 0.0)

    out = jnp.dot(h2, w3_ref[...], preferred_element_type=jnp.float32) + b3
    o_ref[...] = out.astype(o_ref.dtype)


def _round_up(a, m):
    return ((a + m - 1) // m) * m


def value_network_forward(x, params, *, tm_max=1024):
    """Run the fused MLP Pallas kernel.

    x: (B, input_size) float32
    params: dict with w1 (in,32), b1 (1,32), w2 (32,32), b2 (1,32),
            w3 (32,1), b3 (1,1)
    returns: (B, 1) float32 state values
    """
    B, in_size = x.shape
    out_size = params["w3"].shape[1]     # 1

    # Batch tile: multiple of 8 (f32 sublane) when tiling; block == full array
    # for tiny batches (always a legal block shape, no padding needed).
    if B <= 8:
        TM, Bp = B, B
    else:
        TM = min(tm_max, _round_up(B, 8))
        Bp = _round_up(B, TM)

    xp = x if Bp == B else jnp.pad(x, ((0, Bp - B), (0, 0)))

    # Weights/biases stay VMEM-resident across all grid steps.
    resident = lambda a: pl.BlockSpec(a.shape, lambda i: (0, 0))

    out = pl.pallas_call(
        _value_mlp_kernel,
        out_shape=jax.ShapeDtypeStruct((Bp, out_size), jnp.float32),
        grid=(Bp // TM,),
        in_specs=[
            pl.BlockSpec((TM, in_size), lambda i: (i, 0)),
            resident(params["w1"]), resident(params["b1"]),
            resident(params["w2"]), resident(params["b2"]),
            resident(params["w3"]), resident(params["b3"]),
        ],
        out_specs=pl.BlockSpec((TM, out_size), lambda i: (i, 0)),
        compiler_params=pltpu.CompilerParams(
            dimension_semantics=("parallel",)),   # v7x: shard batch over 2 TCs
    )(xp, params["w1"], params["b1"], params["w2"], params["b2"],
      params["w3"], params["b3"])

    return out if Bp == B else out[:B]


def init_params(key, input_size, hidden, output_size):
    """Deterministic init mimicking nn.Linear default (U[-1/sqrt(fan_in), +])."""
    ks = jax.random.split(key, 6)

    def linear(kw, kb, fan_in, fan_out):
        bound = 1.0 / jnp.sqrt(jnp.float32(fan_in))
        # Stored as (in, out): equals PyTorch weight (out, in) transposed.
        w = jax.random.uniform(kw, (fan_in, fan_out), jnp.float32, -bound, bound)
        b = jax.random.uniform(kb, (1, fan_out), jnp.float32, -bound, bound)
        return w, b

    w1, b1 = linear(ks[0], ks[1], input_size, hidden)
    w2, b2 = linear(ks[2], ks[3], hidden, hidden)
    w3, b3 = linear(ks[4], ks[5], hidden, output_size)
    return {"w1": w1, "b1": b1, "w2": w2, "b2": b2, "w3": w3, "b3": b3}


def _ref_forward(x, p):
    h1 = jnp.maximum(x @ p["w1"] + p["b1"], 0.0)
    h2 = jnp.maximum(h1 @ p["w2"] + p["b2"], 0.0)
    return h2 @ p["w3"] + p["b3"]


if __name__ == "__main__":
    key = jax.random.PRNGKey(0)
    k_x, k_x2, k_p = jax.random.split(key, 3)

    batch = 2
    input_size = 4    # e.g. CartPole observation dim
    hidden = 32
    output_size = 1   # scalar state value

    params = init_params(k_p, input_size, hidden, output_size)

    # Small-batch path (single full block, no padding).
    x = jax.random.normal(k_x, (batch, input_size), jnp.float32)
    vals = jax.block_until_ready(value_network_forward(x, params))
    assert vals.shape == (batch, output_size)
    assert jnp.allclose(vals, _ref_forward(x, params), atol=1e-5, rtol=1e-5)

    # Larger batch to exercise the tiled / padded pipelined path.
    B2 = 300
    x2 = jax.random.normal(k_x2, (B2, input_size), jnp.float32)
    vals2 = jax.block_until_ready(value_network_forward(x2, params, tm_max=128))
    assert vals2.shape == (B2, output_size)
    assert jnp.allclose(vals2, _ref_forward(x2, params), atol=1e-5, rtol=1e-5)

    print("KERNEL_OK")
</pallas_src>

<mosaic_0001>
module attributes {stable_mosaic.version = 11 : i64} {
  func.func @_value_mlp_kernel(%arg0: i32, %arg1: memref<2x4xf32, #tpu.memory_space<vmem>>, %arg2: memref<4x32xf32, #tpu.memory_space<vmem>>, %arg3: memref<1x32xf32, #tpu.memory_space<vmem>>, %arg4: memref<32x32xf32, #tpu.memory_space<vmem>>, %arg5: memref<1x32xf32, #tpu.memory_space<vmem>>, %arg6: memref<32x1xf32, #tpu.memory_space<vmem>>, %arg7: memref<1x1xf32, #tpu.memory_space<vmem>>, %arg8: memref<2x1xf32, #tpu.memory_space<vmem>>) attributes {dimension_semantics = [#tpu.dimension_semantics<parallel>], iteration_bounds = array<i64: 1>, scalar_prefetch = 0 : i64, scratch_operands = 0 : i64, tpu.core_type = #tpu.core_type<tc>, window_params = [{transform_indices = @transform_0, window_bounds = array<i64: 2, 4>}, {pipeline_mode = #tpu.pipeline_mode<synchronous>, transform_indices = @transform_1, window_bounds = array<i64: 4, 32>}, {pipeline_mode = #tpu.pipeline_mode<synchronous>, transform_indices = @transform_2, window_bounds = array<i64: 1, 32>}, {pipeline_mode = #tpu.pipeline_mode<synchronous>, transform_indices = @transform_3, window_bounds = array<i64: 32, 32>}, {pipeline_mode = #tpu.pipeline_mode<synchronous>, transform_indices = @transform_4, window_bounds = array<i64: 1, 32>}, {pipeline_mode = #tpu.pipeline_mode<synchronous>, transform_indices = @transform_5, window_bounds = array<i64: 32, 1>}, {pipeline_mode = #tpu.pipeline_mode<synchronous>, transform_indices = @transform_6, window_bounds = array<i64: 1, 1>}, {transform_indices = @transform_7, window_bounds = array<i64: 2, 1>}]} {
    %c0 = arith.constant 0 : index
    %c0_0 = arith.constant 0 : index
    %0 = vector.load %arg1[%c0, %c0_0] : memref<2x4xf32, #tpu.memory_space<vmem>>, vector<2x4xf32>
    %c0_1 = arith.constant 0 : index
    %c0_2 = arith.constant 0 : index
    %1 = vector.load %arg3[%c0_1, %c0_2] : memref<1x32xf32, #tpu.memory_space<vmem>>, vector<1x32xf32>
    %c0_3 = arith.constant 0 : index
    %c0_4 = arith.constant 0 : index
    %2 = vector.load %arg5[%c0_3, %c0_4] : memref<1x32xf32, #tpu.memory_space<vmem>>, vector<1x32xf32>
    %c0_5 = arith.constant 0 : index
    %c0_6 = arith.constant 0 : index
    %3 = vector.load %arg7[%c0_5, %c0_6] : memref<1x1xf32, #tpu.memory_space<vmem>>, vector<1x1xf32>
    %c0_7 = arith.constant 0 : index
    %c0_8 = arith.constant 0 : index
    %4 = vector.load %arg2[%c0_7, %c0_8] : memref<4x32xf32, #tpu.memory_space<vmem>>, vector<4x32xf32>
    %cst = arith.constant dense<0.000000e+00> : vector<2x32xf32>
    %5 = tpu.matmul %0, %4, %cst {dimension_numbers = #tpu.dot_dimension_numbers<[1], [0], [0], [1], [0, 0, 1, 1], [], []>} : vector<2x4xf32>, vector<4x32xf32>, vector<2x32xf32> -> vector<2x32xf32>
    %6 = vector.broadcast %1 : vector<1x32xf32> to vector<2x32xf32>
    %7 = arith.addf %5, %6 : vector<2x32xf32>
    %cst_9 = arith.constant 0.000000e+00 : f32
    %8 = vector.broadcast %cst_9 : f32 to vector<2x32xf32>
    %9 = arith.maximumf %7, %8 : vector<2x32xf32>
    %c0_10 = arith.constant 0 : index
    %c0_11 = arith.constant 0 : index
    %10 = vector.load %arg4[%c0_10, %c0_11] : memref<32x32xf32, #tpu.memory_space<vmem>>, vector<32x32xf32>
    %cst_12 = arith.constant dense<0.000000e+00> : vector<2x32xf32>
    %11 = tpu.matmul %9, %10, %cst_12 {dimension_numbers = #tpu.dot_dimension_numbers<[1], [0], [0], [1], [0, 0, 1, 1], [], []>} : vector<2x32xf32>, vector<32x32xf32>, vector<2x32xf32> -> vector<2x32xf32>
    %12 = vector.broadcast %2 : vector<1x32xf32> to vector<2x32xf32>
    %13 = arith.addf %11, %12 : vector<2x32xf32>
    %cst_13 = arith.constant 0.000000e+00 : f32
    %14 = vector.broadcast %cst_13 : f32 to vector<2x32xf32>
    %15 = arith.maximumf %13, %14 : vector<2x32xf32>
    %c0_14 = arith.constant 0 : index
    %c0_15 = arith.constant 0 : index
    %16 = vector.load %arg6[%c0_14, %c0_15] : memref<32x1xf32, #tpu.memory_space<vmem>>, vector<32x1xf32>
    %cst_16 = arith.constant dense<0.000000e+00> : vector<2x1xf32>
    %17 = tpu.matmul %15, %16, %cst_16 {dimension_numbers = #tpu.dot_dimension_numbers<[1], [0], [0], [1], [0, 0, 1, 1], [], []>} : vector<2x32xf32>, vector<32x1xf32>, vector<2x1xf32> -> vector<2x1xf32>
    %18 = vector.broadcast %3 : vector<1x1xf32> to vector<2x1xf32>
    %19 = arith.addf %17, %18 : vector<2x1xf32>
    %c0_17 = arith.constant 0 : index
    %c0_18 = arith.constant 0 : index
    %20 = vector.load %arg8[%c0_17, %c0_18] : memref<2x1xf32, #tpu.memory_space<vmem>>, vector<2x1xf32>
    tpu.vector_store %arg8[%c0_17, %c0_18], %19 {strides = array<i32>} : memref<2x1xf32, #tpu.memory_space<vmem>>, vector<2x1xf32>,
    return
  }
  func.func @transform_0(%arg0: i32) -> (i32, i32) {
    %c0_i32 = arith.constant 0 : i32
    %c0_i32_0 = arith.constant 0 : i32
    return %arg0, %c0_i32 : i32, i32
  }
  func.func @transform_1(%arg0: i32) -> (i32, i32) {
    %c0_i32 = arith.constant 0 : i32
    %c0_i32_0 = arith.constant 0 : i32
    %c0_i32_1 = arith.constant 0 : i32
    return %c0_i32, %c0_i32_0 : i32, i32
  }
  func.func @transform_2(%arg0: i32) -> (i32, i32) {
    %c0_i32 = arith.constant 0 : i32
    %c0_i32_0 = arith.constant 0 : i32
    %c0_i32_1 = arith.constant 0 : i32
    return %c0_i32, %c0_i32_0 : i32, i32
  }
  func.func @transform_3(%arg0: i32) -> (i32, i32) {
    %c0_i32 = arith.constant 0 : i32
    %c0_i32_0 = arith.constant 0 : i32
    %c0_i32_1 = arith.constant 0 : i32
    return %c0_i32, %c0_i32_0 : i32, i32
  }
  func.func @transform_4(%arg0: i32) -> (i32, i32) {
    %c0_i32 = arith.constant 0 : i32
    %c0_i32_0 = arith.constant 0 : i32
    %c0_i32_1 = arith.constant 0 : i32
    return %c0_i32, %c0_i32_0 : i32, i32
  }
  func.func @transform_5(%arg0: i32) -> (i32, i32) {
    %c0_i32 = arith.constant 0 : i32
    %c0_i32_0 = arith.constant 0 : i32
    %c0_i32_1 = arith.constant 0 : i32
    return %c0_i32, %c0_i32_0 : i32, i32
  }
  func.func @transform_6(%arg0: i32) -> (i32, i32) {
    %c0_i32 = arith.constant 0 : i32
    %c0_i32_0 = arith.constant 0 : i32
    %c0_i32_1 = arith.constant 0 : i32
    return %c0_i32, %c0_i32_0 : i32, i32
  }
  func.func @transform_7(%arg0: i32) -> (i32, i32) {
    %c0_i32 = arith.constant 0 : i32
    %c0_i32_0 = arith.constant 0 : i32
    return %arg0, %c0_i32 : i32, i32
  }
}

</mosaic_0001>

<bundles_post_ra>
// kernel: tpu_custom_call.1
= control target key start
LH: loop header
LB: loop body
LE: loop exit
PB: predicated region body
PF: predicated region fallthrough
CT: control target
= control target key end

     0   :  { %vm43_vm0 = vcmask 1043456   ;;  %vm39_vm1 = vcmask 31744   ;;  %v353_v0 = vmov 0.0   ;;  %vm354_vm2 = vmmov 0   ;;  %s440_s1 = inlined_call_operand.vmem [shape: f32[4,32], index: 1, kind: input, shape index: {}]   ;;  %s441_s0 = inlined_call_operand.vmem [shape: f32[2,4], index: 0, kind: input, shape index: {}]   ;;  %s442_s3 = inlined_call_operand.vmem [shape: f32[32,32], index: 3, kind: input, shape index: {}]   ;;  %s443_s5 = inlined_call_operand.vmem [shape: f32[32,1], index: 5, kind: input, shape index: {}]   ;;  %s444_s2 = inlined_call_operand.vmem [shape: f32[1,32], index: 2, kind: input, shape index: {}]   ;;  %s445_s6 = inlined_call_operand.<no memory space> [shape: f32[1,1], index: 6, kind: input, shape index: {}]   ;;  %s446_s4 = inlined_call_operand.vmem [shape: f32[1,32], index: 4, kind: input, shape index: {}]   ;;  %s447_s7 = inlined_call_operand.vmem [shape: f32[2,1], index: 7, kind: output, shape index: {}]  }
   0x1   :  { %311 = vmatprep.subr.mxu0 %v353_v0  ;;  %v32_v1 = vld [vmem:[%s440_s1] sm:$0xf]  ;;  %313 = vmatprep.mubr.msk.f32.mxu0 %vm354_vm2, %v353_v0  ;;  %v355_v4 = vmov 0.0|0.0   ;;  %v119_v5 = vld [vmem:[%s442_s3 + $0x8] sm:$0xff]  ;;  %v120_v7 = vld [vmem:[%s442_s3 + $0x10] sm:$0xff]  ;;  %vm128_vm3 = vcmask 261120   ;;  %v12_v21 = vstv %s445_s6 }
   0x2   :  { %v28_v2 = vld [vmem:[%s441_s0] sm:$0x3]  ;;  %312 = vmatpush3.msk.msra.mxu0 %vm43_vm0, %v32_v1  ;;  %338 = vmatprep.subr.bf16.mxu1 %v355_v4  ;;  %v121_v8 = vld [vmem:[%s442_s3 + $0x18] sm:$0xff]  ;;  %v204_v11 = vld [vmem:[%s443_s5 + $0x8] sm:$0xff]  ;;  %13 = vst [vmem:[#allocation2] sm:$0x1] %v12_v21 }
   0x3   :  { %v118_v3 = vld [vmem:[%s442_s3] sm:$0xff]  ;;  %314 = vmatmul.mubr.msk.f32.vlgmr.msra.gmra.mrb[0].mxu0 %vm39_vm1, %v28_v2  ;;  %324 = vmatprep.mubr.msk.f32.mxu1 %vm354_vm2, %v353_v0  ;;  %v342_v9 = vpack.c.bf16 %v121_v8, %v120_v7  ;;  %v205_v18 = vld [vmem:[%s443_s5 + $0x10] sm:$0xff]  ;;  %v206_v19 = vld [vmem:[%s443_s5 + $0x18] sm:$0xff]  ;;  %vm286_vm4 = vcmask 1024  }
   0x4   :  { %v339_v6 = vpack.c.bf16 %v119_v5, %v118_v3  ;;  %344 = vmatprep.subr.bf16.mxu0 %v355_v4  ;;  %335 = vmatprep.mubr.msk.f32.mxu0 %vm354_vm2, %v353_v0  ;;  %v203_v10 = vld [vmem:[%s443_s5] sm:$0xff]  ;;  %v348_v20 = vpack.c.bf16 %v206_v19, %v205_v18 }
   0x5   :  { %v345_v12 = vpack.c.bf16 %v204_v11, %v203_v10  ;;  %v292_v13 = vld [vmem:[%s444_s2] ss:$0 sm:$0xff] }
   0x6   :  { %340 = vmatpush3.bf16.msra.mxu1 %v339_v6  ;;  %v295_v22 = vld [vmem:[%s446_s4] ss:$0 sm:$0xff] }
   0x7   :  { %341 = vmatprep.subr.bf16.mxu1 %v355_v4  ;;  %346 = vmatpush3.bf16.msra.mxu0 %v345_v12 }
   0x8   :  { %347 = vmatprep.subr.bf16.mxu0 %v355_v4 }
   0x9   :  { %v297_v27 = vld [vmem:[#allocation2] ss:$0 sm:$0xff] }
   0xa   :  { %343 = vmatpush3.bf16.msra.mxu1 %v342_v9 }
   0xb   :  { %349 = vmatpush3.bf16.msra.mxu0 %v348_v20 }
  0xd6   :  { %v113_v14 = vpop.f32.mrb[0].mxu0 }
  0xd7   :  { %v114_v15 = vadd.f32 %v292_v13, %v113_v14  ;;  %v315_v16 = vpop.f32.mrb[1].mxu0 }
  0xd9   :  { %v117_v17 = vmax.f32 %v114_v15, 0.0 }
  0xdb   :  { %325 = vmatmul.mubr.msk.f32.vlgmr.msra.gmra.mrb[0].mxu1 %vm128_vm3, %v117_v17 }
 0x1ae   :  { %v198_v23 = vpop.f32.mrb[0].mxu1 }
 0x1af   :  { %v199_v24 = vadd.f32 %v295_v22, %v198_v23  ;;  %v326_v25 = vpop.f32.mrb[1].mxu1 }
 0x1b1   :  { %v202_v26 = vmax.f32 %v199_v24, 0.0 }
 0x1b3   :  { %336 = vmatmul.mubr.msk.f32.vlgmr.msra.gmra.mrb[2].mxu0 %vm128_vm3, %v202_v26 }
 0x286   :  { %v282_v28 = vpop.f32.mrb[2].mxu0 }
 0x287   :  { %v283_v29 = vadd.f32 %v297_v27, %v282_v28  ;;  %v337_v30 = vpop.f32.mrb[3].mxu0 }
 0x289   :  { %287 = vst.msk [vmem:[%s447_s7] sm:$0x3] %vm286_vm4, %v283_v29 }

</bundles_post_ra>
